<compile_context>
chip_gen: v6e
topology: v6e:2x2x1
jax: 0.10.0
libtpu: 0.0.40
codegen_flags: <defaults>
</compile_context>

<pallas_src>
import functools

import jax
import jax.numpy as jnp
from jax.experimental import pallas as pl
from jax.experimental.pallas import tpu as pltpu

_CLS_CHANNELS = 16
_TN = 8192           # lane tile; 8192..16384 is the recommended sweep range
_LOG_CLAMP = -100.0  # torch F.binary_cross_entropy clamps logs at -100


def _round_up(x, m):
    return ((x + m - 1) // m) * m


# ---------------------------------------------------------------------------
# Pallas kernel: sum over all valid locations/channels of the QFLv2 negative
# term  min(softplus(s), 100) * sigmoid(s)^2  (== BCE(sigmoid(s), 0)*p^2 with
# torch's -100 log clamp).
# ---------------------------------------------------------------------------
def _qfl_neg_kernel(s_ref, out_ref, *, n_valid, tn, fold):
    c = s_ref.shape[0]
    col0 = pl.program_id(0) * tn
    lane = jax.lax.broadcasted_iota(jnp.int32, (1, tn), 1)
    valid = (col0 + lane) < n_valid                       # [1, tn] bool

    s = s_ref[...].astype(jnp.float32)                    # [C, tn]
    e = jnp.exp(-jnp.abs(s))                              # EUP exp
    softplus = jnp.maximum(s, 0.0) + jnp.log1p(e)         # EUP log1p
    # sigmoid(s) from e via one approx reciprocal (EUP vrcp) instead of a
    # third full-precision transcendental.
    r = pl.reciprocal(1.0 + e, approx=True)
    p = jnp.where(s >= 0.0, r, e * r)
    loss = jnp.minimum(softplus, -_LOG_CLAMP) * p * p      # BCE(p,0) * p^2
    # select (not multiply): garbage (NaN/Inf) in the ragged last tile -> 0.0
    loss = jnp.where(valid, loss, 0.0)

    # Fold class channels onto `fold` sublane rows (pure VPU adds) ...
    folded = loss[0:fold, :]
    for r0 in range(fold, c, fold):
        folded = folded + loss[r0:r0 + fold, :]
    # ... then fold the lane tile to one lane-dense (fold, 128) block.
    acc = folded[:, 0:128]
    for j in range(128, tn, 128):
        acc = acc + folded[:, j:j + 128]
    out_ref[...] = acc[None]


def qflv2_neg_sum(s_cls, *, tn=_TN):
    """sum_{n,c} BCE(sigmoid(s_cls), 0) * sigmoid(s_cls)^2 for s_cls of shape [C, N]."""
    c, n = s_cls.shape
    fold = 8 if c % 8 == 0 else c
    tn = min(tn, _round_up(max(n, 1), 128))   # never allocate more than one ragged tile
    blocks = pl.cdiv(n, tn)
    kernel = functools.partial(_qfl_neg_kernel, n_valid=n, tn=tn, fold=fold)
    partial_sums = pl.pallas_call(
        kernel,
        grid=(blocks,),
        in_specs=[pl.BlockSpec((c, tn), lambda i: (0, i))],
        out_specs=pl.BlockSpec((1, fold, 128), lambda i: (i, 0, 0)),
        out_shape=jax.ShapeDtypeStruct((blocks, fold, 128), jnp.float32),
        compiler_params=pltpu.CompilerParams(
            dimension_semantics=("parallel",)),
    )(s_cls)
    return jnp.sum(partial_sums)


# ---------------------------------------------------------------------------
# Plain-JAX pieces (shape conversion, top-k selection, positive-column terms)
# ---------------------------------------------------------------------------
def convert_shape_cm(logits, cls_channels):
    """Channel-major variant of RotatedDTBLLoss.convert_shape.

    Returns cls [C, N], bbox [5, N], cent [1, N] with one consistent column
    ordering across all streams (level-major instead of the reference's
    batch-major; every loss output is a permutation-invariant sum/mean, so the
    scalar results are identical).  fpn_feat is unused by the loss.
    """
    cls_scores, bbox_preds, angle_preds, centernesses, fpn_feat = logits
    assert (len(cls_scores) == len(bbox_preds) == len(angle_preds)
            == len(centernesses) == len(fpn_feat))
    bs = cls_scores[0].shape[0]

    def cm(x):  # [bs, C, H, W] -> [C, bs*H*W]
        ch = x.shape[1]
        return jnp.transpose(x.reshape(bs, ch, -1), (1, 0, 2)).reshape(ch, -1)

    cls = jnp.concatenate([cm(x) for x in cls_scores], axis=1)
    bbox = jnp.concatenate(
        [cm(jnp.concatenate([x, y], axis=1))
         for x, y in zip(bbox_preds, angle_preds)], axis=1)
    cent = jnp.concatenate([cm(x) for x in centernesses], axis=1)
    assert cls.shape[0] == cls_channels
    return cls, bbox, cent


def _bce_with_logit(logit, target):
    """F.binary_cross_entropy(sigmoid(logit), target) with torch's -100 log clamp."""
    log_p = jnp.maximum(jax.nn.log_sigmoid(logit), _LOG_CLAMP)
    log_1mp = jnp.maximum(jax.nn.log_sigmoid(-logit), _LOG_CLAMP)
    return -(target * log_p + (1.0 - target) * log_1mp)


def rotated_dtbl_loss(teacher_logits, student_logits, p_selection,
                      cls_channels=_CLS_CHANNELS, transfer_dtype=None, tn=_TN):
    """Forward of RotatedDTBLLoss (bbox_loss_type='l1', loss_type='origin')."""
    t_cls, t_bbox, t_cent = convert_shape_cm(teacher_logits, cls_channels)
    s_cls, s_bbox, s_cent = convert_shape_cm(student_logits, cls_channels)

    mode = p_selection.get('mode', 'topk')
    k = p_selection.get('k', 0.01)
    # TODO(synk): 'top_dps', 'catwise_top_dps' and 'global_w' selection modes need
    # data-dependent top-k sizes / per-category loops, and bbox_loss_type='iou'
    # needs the rotated-IoU decode; only static-k 'topk' + 'l1' is implemented.
    assert mode == 'topk'

    n = t_cls.shape[1]

    # --- pseudo-label selection (torch.no_grad section): tiny data-dependent
    # top-k bookkeeping kept in plain JAX.  max(sigmoid(x)) == sigmoid(max(x)).
    t_scores = jax.nn.sigmoid(jnp.max(t_cls, axis=0))              # [N]
    s_dps = jnp.mean(t_scores)
    topk_num = max(int(n * k), 2)
    pos_vals, pos_inds = jax.lax.top_k(t_scores, topk_num)
    _, neg_inds = jax.lax.top_k(-t_scores, topk_num)
    # Same write order as the reference: positives first, negatives overwrite.
    mask = (jnp.zeros((n,), jnp.float32)
            .at[pos_inds].set(1.0)
            .at[neg_inds].set(-1.0))
    pos_mask = mask > 0.0
    is_pos = pos_mask[pos_inds].astype(jnp.float32)                # [K]
    pos_cnt = jnp.sum(is_pos)
    fg_num = jnp.sum(pos_vals)

    # --- hot path: QFLv2 negative term over every location (Pallas kernel).
    # transfer_dtype=jnp.bfloat16 halves the kernel HBM read (v5e/v6e win) at
    # a small numerics cost; default None keeps exact f32 semantics.
    s_cls_k = s_cls if transfer_dtype is None else s_cls.astype(transfer_dtype)
    neg_sum = qflv2_neg_sum(s_cls_k, tn=tn)

    # --- positive-location terms (~1% of columns): plain JAX on gathered columns.
    sc = jnp.take(s_cls_k, pos_inds, axis=1).astype(jnp.float32)   # [C, K]
    tc = jnp.take(t_cls, pos_inds, axis=1).astype(jnp.float32)     # [C, K]
    sb = jnp.take(s_bbox, pos_inds, axis=1).astype(jnp.float32)    # [5, K]
    tb = jnp.take(t_bbox, pos_inds, axis=1).astype(jnp.float32)    # [5, K]
    scn = jnp.take(s_cent, pos_inds, axis=1).astype(jnp.float32)   # [1, K]
    tcn = jnp.take(t_cent, pos_inds, axis=1).astype(jnp.float32)   # [1, K]
    w = is_pos[None, :]

    # QFLv2 positive overwrite: on positive columns, replace the negative term
    # (already counted by the kernel) with BCE(p, q) * (q - p)^2.
    p = jax.nn.sigmoid(sc)
    q = jax.nn.sigmoid(tc)
    pos_term = _bce_with_logit(sc, q) * (q - p) ** 2
    neg_term = jnp.minimum(jax.nn.softplus(sc), -_LOG_CLAMP) * p * p
    cls_sum = neg_sum + jnp.sum(w * (pos_term - neg_term))

    # SmoothL1 bbox loss (beta=1) weighted by teacher centerness sigmoid.
    d = sb - tb
    ad = jnp.abs(d)
    sl1 = jnp.where(ad < 1.0, 0.5 * d * d, ad - 0.5)               # [5, K]
    t_cent_sig = jax.nn.sigmoid(tcn)                               # [1, K]
    bbox_sum = jnp.sum(w * sl1 * t_cent_sig)

    # Centerness BCE on positives.
    cent_sum = jnp.sum(w * _bce_with_logit(scn, t_cent_sig))

    unsup_loss_cls = cls_sum / fg_num
    unsup_loss_bbox = bbox_sum / (pos_cnt * 5.0)   # mean over [fg, 5]
    unsup_loss_centerness = cent_sum / pos_cnt     # mean over [fg, 1]
    return dict(loss_cls=unsup_loss_cls,
                loss_bbox=unsup_loss_bbox,
                loss_centerness=unsup_loss_centerness,
                S_dps=s_dps)


if __name__ == "__main__":
    key = jax.random.PRNGKey(0)
    bs = 2
    cls_channels = _CLS_CHANNELS
    spatial = [16, 8, 4, 2, 1]  # one feature map per FPN stride (8,16,32,64,128)

    def make_logits(key):
        cls_l, bbox_l, ang_l, cent_l, feat_l = [], [], [], [], []
        for s in spatial:
            key, k1, k2, k3, k4, k5 = jax.random.split(key, 6)
            cls_l.append(jax.random.normal(k1, (bs, cls_channels, s, s), jnp.float32))
            bbox_l.append(jax.random.normal(k2, (bs, 4, s, s), jnp.float32))
            ang_l.append(jax.random.normal(k3, (bs, 1, s, s), jnp.float32))
            cent_l.append(jax.random.normal(k4, (bs, 1, s, s), jnp.float32))
            feat_l.append(jax.random.normal(k5, (bs, 256, s, s), jnp.float32))
        return (cls_l, bbox_l, ang_l, cent_l, feat_l), key

    teacher_logits, key = make_logits(key)
    student_logits, key = make_logits(key)

    p_selection = dict(mode='topk', k=0.01, beta=1.0)
    losses = rotated_dtbl_loss(teacher_logits, student_logits, p_selection,
                               cls_channels)
    losses = {name: jax.block_until_ready(v) for name, v in losses.items()}
    for name, v in losses.items():
        assert bool(jnp.isfinite(v)), f"non-finite value for {name}"
    print("KERNEL_OK")
</pallas_src>

<mosaic_0001>
module attributes {stable_mosaic.version = 11 : i64} {
  func.func @_qfl_neg_kernel(%arg0: i32, %arg1: memref<16x768xf32, #tpu.memory_space<vmem>>, %arg2: memref<1x8x128xf32, #tpu.memory_space<vmem>>) attributes {dimension_semantics = [#tpu.dimension_semantics<parallel>], iteration_bounds = array<i64: 1>, scalar_prefetch = 0 : i64, scratch_operands = 0 : i64, tpu.core_type = #tpu.core_type<tc>, window_params = [{transform_indices = @transform_0, window_bounds = array<i64: 16, 768>}, {transform_indices = @transform_1, window_bounds = array<i64: 1, 8, 128>}]} {
    %c768_i32 = arith.constant 768 : i32
    %0 = arith.muli %arg0, %c768_i32 : i32
    %1 = tpu.iota {dimensions = array<i32: 1>} : vector<1x768xi32>
    %2 = vector.broadcast %0 : i32 to vector<1x768xi32>
    %3 = arith.addi %2, %1 : vector<1x768xi32>
    %c682_i32 = arith.constant 682 : i32
    %4 = vector.broadcast %c682_i32 : i32 to vector<1x768xi32>
    %5 = arith.cmpi slt, %3, %4 : vector<1x768xi32>
    %c0 = arith.constant 0 : index
    %c0_0 = arith.constant 0 : index
    %6 = vector.load %arg1[%c0, %c0_0] : memref<16x768xf32, #tpu.memory_space<vmem>>, vector<16x768xf32>
    %7 = math.absf %6 : vector<16x768xf32>
    %cst = arith.constant 0.000000e+00 : f32
    %8 = vector.broadcast %cst : f32 to vector<16x768xf32>
    %9 = arith.subf %8, %7 : vector<16x768xf32>
    %10 = math.exp %9 : vector<16x768xf32>
    %cst_1 = arith.constant 0.000000e+00 : f32
    %11 = vector.broadcast %cst_1 : f32 to vector<16x768xf32>
    %12 = arith.maximumf %6, %11 : vector<16x768xf32>
    %13 = math.log1p %10 : vector<16x768xf32>
    %14 = arith.addf %12, %13 : vector<16x768xf32>
    %cst_2 = arith.constant 1.000000e+00 : f32
    %15 = vector.broadcast %cst_2 : f32 to vector<16x768xf32>
    %16 = arith.addf %15, %10 : vector<16x768xf32>
    %17 = tpu.reciprocal %16 {approx = true} : vector<16x768xf32> -> vector<16x768xf32>
    %cst_3 = arith.constant 0.000000e+00 : f32
    %18 = vector.broadcast %cst_3 : f32 to vector<16x768xf32>
    %19 = arith.cmpf oge, %6, %18 : vector<16x768xf32>
    %20 = arith.mulf %10, %17 : vector<16x768xf32>
    %21 = arith.select %19, %17, %20 : vector<16x768xi1>, vector<16x768xf32>
    %cst_4 = arith.constant 1.000000e+02 : f32
    %22 = vector.broadcast %cst_4 : f32 to vector<16x768xf32>
    %23 = arith.minimumf %14, %22 : vector<16x768xf32>
    %24 = arith.mulf %23, %21 : vector<16x768xf32>
    %25 = arith.mulf %24, %21 : vector<16x768xf32>
    %cst_5 = arith.constant 0.000000e+00 : f32
    %26 = vector.shape_cast %5 : vector<1x768xi1> to vector<1x768xi1>
    %27 = vector.broadcast %26 : vector<1x768xi1> to vector<16x768xi1>
    %28 = vector.broadcast %cst_5 : f32 to vector<16x768xf32>
    %29 = arith.select %27, %25, %28 : vector<16x768xi1>, vector<16x768xf32>
    %30 = vector.extract_strided_slice %29 {offsets = [0, 0], sizes = [8, 768], strides = [1, 1]} : vector<16x768xf32> to vector<8x768xf32>
    %31 = vector.extract_strided_slice %29 {offsets = [8, 0], sizes = [8, 768], strides = [1, 1]} : vector<16x768xf32> to vector<8x768xf32>
    %32 = arith.addf %30, %31 : vector<8x768xf32>
    %33 = vector.extract_strided_slice %32 {offsets = [0, 0], sizes = [8, 128], strides = [1, 1]} : vector<8x768xf32> to vector<8x128xf32>
    %34 = vector.extract_strided_slice %32 {offsets = [0, 128], sizes = [8, 128], strides = [1, 1]} : vector<8x768xf32> to vector<8x128xf32>
    %35 = arith.addf %33, %34 : vector<8x128xf32>
    %36 = vector.extract_strided_slice %32 {offsets = [0, 256], sizes = [8, 128], strides = [1, 1]} : vector<8x768xf32> to vector<8x128xf32>
    %37 = arith.addf %35, %36 : vector<8x128xf32>
    %38 = vector.extract_strided_slice %32 {offsets = [0, 384], sizes = [8, 128], strides = [1, 1]} : vector<8x768xf32> to vector<8x128xf32>
    %39 = arith.addf %37, %38 : vector<8x128xf32>
    %40 = vector.extract_strided_slice %32 {offsets = [0, 512], sizes = [8, 128], strides = [1, 1]} : vector<8x768xf32> to vector<8x128xf32>
    %41 = arith.addf %39, %40 : vector<8x128xf32>
    %42 = vector.extract_strided_slice %32 {offsets = [0, 640], sizes = [8, 128], strides = [1, 1]} : vector<8x768xf32> to vector<8x128xf32>
    %43 = arith.addf %41, %42 : vector<8x128xf32>
    %44 = vector.shape_cast %43 : vector<8x128xf32> to vector<1x8x128xf32>
    %c0_6 = arith.constant 0 : index
    %c0_7 = arith.constant 0 : index
    %c0_8 = arith.constant 0 : index
    %45 = vector.load %arg2[%c0_6, %c0_7, %c0_8] : memref<1x8x128xf32, #tpu.memory_space<vmem>>, vector<1x8x128xf32>
    tpu.vector_store %arg2[%c0_6, %c0_7, %c0_8], %44 {strides = array<i32>} : memref<1x8x128xf32, #tpu.memory_space<vmem>>, vector<1x8x128xf32>,
    return
  }
  func.func @transform_0(%arg0: i32) -> (i32, i32) {
    %c0_i32 = arith.constant 0 : i32
    %c0_i32_0 = arith.constant 0 : i32
    return %c0_i32, %arg0 : i32, i32
  }
  func.func @transform_1(%arg0: i32) -> (i32, i32, i32) {
    %c0_i32 = arith.constant 0 : i32
    %c0_i32_0 = arith.constant 0 : i32
    %c0_i32_1 = arith.constant 0 : i32
    return %arg0, %c0_i32, %c0_i32_0 : i32, i32, i32
  }
}

</mosaic_0001>

<bundles_post_ra>
// kernel: tpu_custom_call.1
= control target key start
LH: loop header
LB: loop body
LE: loop exit
PB: predicated region body
PF: predicated region fallthrough
CT: control target
= control target key end

     0   :  { %6 = vsyncpa [#allocation3], 0  ;;  %s899_s0 = inlined_call_operand.hbm [shape: f32[16,682], index: 0, kind: input, shape index: {}]   ;;  %s900_s1 = inlined_call_operand.hbm [shape: f32[1,8,128], index: 1, kind: output, shape index: {}]  }
   0x1   :  { %7 = vsyncpa [#allocation4], 0  ;;  %s503_s6 = smov [#allocation2]  }
   0x2   :  { %s13_s7 = sshll.u32 %s503_s6, 4  ;;  %s14_s7 = int_to_ptr.vmem [resolvable:$true] %s13_s7 }
   0x3   :  { %s467_s8 = scalar_lea.vmem %s14_s7, 1536  ;;  %p472_p1 = scmp.lt.s32.totalorder %s14_s7, %s14_s7 }
   0x4   :  { %p468_p0 = scmp.ne.s32.totalorder %s14_s7, %s467_s8  ;;  %p473_p2 = scmp.lt.s32.totalorder %s467_s8, %s467_s8 }
   0x6   :  { %p474_p3 = por %p473_p2, %p472_p1 }
   0x8   :  { %p475_p4 = pnand %p474_p3, %p468_p0 }
   0xa   :  { %478 = shalt.err (!%p475_p4)
}
   0xb   :  { %s504_s9 = smov 768   ;;  %s505_s10 = smov 48  }
   0xc   :  { %19 = dma.hbm_to_vmem [thread:$0]  %s899_s0, 1536, %s14_s7, [#allocation3], %s504_s9, %s504_s9, %s505_s10  }
   0xd   :  { %499 = dma.done.wait [#allocation3], 1536  }
   0xe   :  { %500 = vsyncadd [#allocation3], 4294965760  ;;  %v520_v0 = vld [vmem:[#allocation2] sm:$0xff]  ;;  %v522_v1 = vld [vmem:[#allocation2 + $0x8] sm:$0xff]  ;;  %v24_v45 = vlaneseq  ;;  %s506_s0 = smov [#allocation5]  }
   0xf   :  { %v524_v2 = vld [vmem:[#allocation2 + $0x10] sm:$0xff]  ;;  %v526_v3 = vld [vmem:[#allocation2 + $0x18] sm:$0xff]  ;;  %v528_v4 = vld [vmem:[#allocation2 + $0x20] sm:$0xff]  ;;  %v56_v5 = vand.u32 2147483647, %v520_v0  ;;  %vm260_vm11 = vcmp.ge.f32.partialorder %v520_v0, 0.0 }
  0x10   :  { %v531_v6 = vld [vmem:[#allocation2 + $0x28] sm:$0xff]  ;;  %v533_v7 = vld [vmem:[#allocation2 + $0x30] sm:$0xff]  ;;  %v57_v8 = vand.u32 2147483647, %v522_v1  ;;  %v58_v9 = vand.u32 2147483647, %v524_v2 }
  0x11   :  { %v59_v10 = vand.u32 2147483647, %v526_v3  ;;  %v60_v11 = vand.u32 2147483647, %v528_v4  ;;  %v539_v12 = vld [vmem:[#allocation2 + $0x38] sm:$0xff]  ;;  %v68_v15 = vsub.f32 0.0, %v56_v5 }
  0x12   :  { %v61_v13 = vand.u32 2147483647, %v531_v6  ;;  %v62_v14 = vand.u32 2147483647, %v533_v7  ;;  %v543_v16 = vld [vmem:[#allocation2 + $0x40] sm:$0xff]  ;;  %v69_v17 = vsub.f32 0.0, %v57_v8 }
  0x13   :  { %v70_v18 = vsub.f32 0.0, %v58_v9  ;;  %v71_v19 = vsub.f32 0.0, %v59_v10  ;;  %v545_v20 = vld [vmem:[#allocation2 + $0x48] sm:$0xff]  ;;  %v63_v21 = vand.u32 2147483647, %v539_v12  ;;  %v72_v22 = vsub.f32 0.0, %v60_v11 }
  0x14   :  { %v64_v23 = vand.u32 2147483647, %v543_v16  ;;  %v73_v24 = vsub.f32 0.0, %v61_v13  ;;  %v74_v25 = vsub.f32 0.0, %v62_v14  ;;  %v80_v26 = vmul.f32 1.442695, %v68_v15 }
  0x15   :  { %v82_v27 = vmul.f32 1.442695, %v69_v17  ;;  %v84_v28 = vmul.f32 1.442695, %v70_v18  ;;  %v86_v29 = vmul.f32 1.442695, %v71_v19 }
  0x16   :  { %387 = vpow2.f32 %v80_v26  ;;  %v549_v30 = vld [vmem:[#allocation2 + $0x50] sm:$0xff]  ;;  %v65_v31 = vand.u32 2147483647, %v545_v20  ;;  %v75_v32 = vsub.f32 0.0, %v63_v21  ;;  %v88_v33 = vmul.f32 1.442695, %v72_v22 }
  0x17   :  { %389 = vpow2.f32 %v82_v27  ;;  %v90_v34 = vmul.f32 1.442695, %v73_v24  ;;  %v552_v35 = vld [vmem:[#allocation2 + $0x58] sm:$0xff]  ;;  %v76_v36 = vsub.f32 0.0, %v64_v23  ;;  %v92_v37 = vmul.f32 1.442695, %v74_v25 }
  0x18   :  { %391 = vpow2.f32 %v84_v28  ;;  %911 = vst [vmem:[#allocation8_spill] sm:$0xff] %v552_v35  ;;  %v66_v38 = vand.u32 2147483647, %v549_v30  ;;  %v77_v39 = vsub.f32 0.0, %v65_v31  ;;  %v94_v40 = vmul.f32 1.442695, %v75_v32 }
  0x19   :  { %393 = vpow2.f32 %v86_v29  ;;  %v67_v41 = vand.u32 2147483647, %v552_v35  ;;  %v96_v42 = vmul.f32 1.442695, %v76_v36  ;;  %v25_v50 = vand.u32 127, %v24_v45  ;;  %s374_s13 = sshll.u32 %s506_s0, 4  ;;  %s375_s13 = int_to_ptr.vmem [resolvable:$true] %s374_s13 }
  0x1a   :  { %395 = vpow2.f32 %v88_v33  ;;  %v78_v43 = vsub.f32 0.0, %v66_v38  ;;  %v98_v44 = vmul.f32 1.442695, %v77_v39  ;;  %vm261_vm13 = vcmp.ge.f32.partialorder %v522_v1, 0.0  ;;  %s479_s14 = scalar_lea.vmem %s375_s13, 128  ;;  %p484_p6 = scmp.lt.s32.totalorder %s375_s13, %s375_s13 }
  0x1b   :  { %397 = vpow2.f32 %v90_v34  ;;  %v79_v46 = vsub.f32 0.0, %v67_v41  ;;  %v575_v58 = vadd.s32 640, %v25_v50  ;;  %vm262_vm14 = vcmp.ge.f32.partialorder %v524_v2, 0.0  ;;  %p480_p5 = scmp.ne.s32.totalorder %s375_s13, %s479_s14  ;;  %p485_p7 = scmp.lt.s32.totalorder %s479_s14, %s479_s14 }
  0x1c   :  { %399 = vpow2.f32 %v92_v37  ;;  %v100_v47 = vmul.f32 1.442695, %v78_v43  ;;  %v947_v59 = vmax.f32 %v526_v3, 0.0  ;;  %vm263_vm15 = vcmp.ge.f32.partialorder %v526_v3, 0.0 }
  0x1d   :  { %401 = vpow2.f32 %v94_v40  ;;  %v102_v51 = vmul.f32 1.442695, %v79_v46  ;;  %915 = vst [vmem:[#allocation12_spill] sm:$0xff] %v575_v58  ;;  %p486_p8 = por %p485_p7, %p484_p6 }
  0x1e   :  { %403 = vpow2.f32 %v96_v42 }
  0x1f   :  { %405 = vpow2.f32 %v98_v44  ;;  %p487_p9 = pnand %p486_p8, %p480_p5 }
  0x20   :  { %407 = vpow2.f32 %v100_v47 }
  0x21   :  { %409 = vpow2.f32 %v102_v51 }
  0x23   :  { %v556_v48 = vpop.eup %387 }
  0x24   :  { %v558_v49 = vpop.eup %389  ;;  %v563_v53 = vadd.f32 1.0, %v556_v48  ;;  %v119_v63 = vmul.f32 -0.5, %v556_v48  ;;  %v122_v28 = vand.u32 2147483647, %v556_v48 }
  0x25   :  { %v560_v52 = vpop.eup %391  ;;  %v568_v55 = vadd.f32 1.0, %v558_v49  ;;  %v128_v19 = vmul.f32 -0.5, %v558_v49  ;;  %v131_v33 = vand.u32 2147483647, %v558_v49 }
  0x26   :  { %912 = vst [vmem:[#allocation9_spill] sm:$0xff] %v560_v52  ;;  %v565_v54 = vpop.eup %393  ;;  %v571_v56 = vadd.f32 1.0, %v560_v52  ;;  %411 = vlog2.f32 %v563_v53  ;;  %v137_v21 = vmul.f32 -0.5, %v560_v52  ;;  %v120_v24 = vadd.f32 1.0, %v119_v63 }
  0x27   :  { %913 = vst [vmem:[#allocation10_spill] sm:$0xff] %v565_v54  ;;  %v573_v57 = vpop.eup %395  ;;  %v585_v5 = vadd.f32 1.0, %v565_v54  ;;  %413 = vlog2.f32 %v568_v55  ;;  %v146_v29 = vmul.f32 -0.5, %v565_v54  ;;  %v129_v37 = vadd.f32 1.0, %v128_v19 }
  0x28   :  { %914 = vst [vmem:[#allocation11_spill] sm:$0xff] %v573_v57  ;;  %v579_v61 = vpop.eup %397  ;;  %415 = vlog2.f32 %v571_v56  ;;  %v597_v15 = vadd.f32 1.0, %v573_v57  ;;  %v155_v31 = vmul.f32 -0.5, %v573_v57  ;;  %v138_v38 = vadd.f32 1.0, %v137_v21 }
  0x29   :  { %916 = vst [vmem:[#allocation13_spill] sm:$0xff] %v579_v61  ;;  %v587_v8 = vpop.eup %399  ;;  %v605_v22 = vadd.f32 1.0, %v579_v61  ;;  %417 = vlog2.f32 %v585_v5  ;;  %v140_v39 = vand.u32 2147483647, %v560_v52  ;;  %v629_v40 = vmul.f32 %v556_v48, %v120_v24 }
  0x2a   :  { %917 = vst [vmem:[#allocation14_spill] sm:$0xff] %v587_v8  ;;  %v599_v17 = vpop.eup %401  ;;  %v610_v25 = vadd.f32 1.0, %v587_v8  ;;  %419 = vlog2.f32 %v597_v15  ;;  %v164_v41 = vmul.f32 -0.5, %v579_v61  ;;  %vm636_vm0 = vcmp.lt.f32.partialorder %v122_v28, 0.0004427343 }
  0x2b   :  { %918 = vst [vmem:[#allocation15_spill] sm:$0xff] %v599_v17  ;;  %v612_v26 = vpop.eup %403  ;;  %v622_v34 = vadd.f32 1.0, %v599_v17  ;;  %421 = vlog2.f32 %v605_v22  ;;  %v147_v44 = vadd.f32 1.0, %v146_v29  ;;  %v149_v45 = vand.u32 2147483647, %v565_v54 }
  0x2c   :  { %919 = vst [vmem:[#allocation16_spill] sm:$0xff] %v612_v26  ;;  %v624_v36 = vpop.eup %405  ;;  %423 = vlog2.f32 %v610_v25  ;;  %v634_v42 = vadd.f32 1.0, %v612_v26  ;;  %v156_v46 = vadd.f32 1.0, %v155_v31  ;;  %vm644_vm1 = vcmp.lt.f32.partialorder %v131_v33, 0.0004427343 }
  0x2d   :  { %425 = vlog2.f32 %v622_v34  ;;  %v642_v47 = vpop.eup %407  ;;  %v173_v51 = vmul.f32 -0.5, %v587_v8  ;;  %v182_v63 = vmul.f32 -0.5, %v599_v17  ;;  %v652_v19 = vadd.f32 1.0, %v624_v36 }
  0x2e   :  { %427 = vlog2.f32 %v634_v42  ;;  %v655_v21 = vmul.f32 %v558_v49, %v129_v37  ;;  %v658_v24 = vmul.f32 %v560_v52, %v138_v38  ;;  %vm660_vm2 = vcmp.lt.f32.partialorder %v140_v39, 0.0004427343  ;;  %v665_v31 = vpop.eup %409  ;;  %v955_v38 = vld [vmem:[#allocation8_spill] sm:$0xff] }
  0x2f   :  { %v191_v29 = vmul.f32 -0.5, %v612_v26  ;;  %v158_v33 = vand.u32 2147483647, %v573_v57  ;;  %v165_v32 = vadd.f32 1.0, %v164_v41  ;;  %v167_v27 = vand.u32 2147483647, %v579_v61 }
  0x30   :  { %429 = vlog2.f32 %v652_v19  ;;  %v671_v23 = vmul.f32 %v565_v54, %v147_v44  ;;  %vm673_vm3 = vcmp.lt.f32.partialorder %v149_v45, 0.0004427343  ;;  %v678_v39 = vmul.f32 %v573_v57, %v156_v46 }
  0x31   :  { %v176_v18 = vand.u32 2147483647, %v587_v8  ;;  %v682_v14 = vadd.f32 1.0, %v642_v47  ;;  %v174_v13 = vadd.f32 1.0, %v173_v51  ;;  %v183_v11 = vadd.f32 1.0, %v182_v63 }
  0x32   :  { %v185_v10 = vand.u32 2147483647, %v599_v17  ;;  %v200_v44 = vmul.f32 -0.5, %v624_v36  ;;  %v192_v45 = vadd.f32 1.0, %v191_v29  ;;  %v194_v62 = vand.u32 2147483647, %v612_v26 }
  0x33   :  { %v412_v37 = vpop.eup %411  ;;  %431 = vlog2.f32 %v682_v14  ;;  %v689_v46 = vadd.f32 1.0, %v665_v31  ;;  %vm691_vm4 = vcmp.lt.f32.partialorder %v158_v33, 0.0004427343  ;;  %v696_v51 = vmul.f32 %v579_v61, %v165_v32 }
  0x34   :  { %v414_v41 = vpop.eup %413  ;;  %v118_v60 = vmul.f32 0.6931472, %v412_v37  ;;  %vm698_vm5 = vcmp.lt.f32.partialorder %v167_v27, 0.0004427343  ;;  %v203_v29 = vand.u32 2147483647, %v624_v36  ;;  %v710_v32 = vmul.f32 %v587_v8, %v174_v13 }
  0x35   :  { %v416_v9 = vpop.eup %415  ;;  %v127_v57 = vmul.f32 0.6931472, %v414_v41  ;;  %vm703_vm6 = vcmp.lt.f32.partialorder %v176_v18, 0.0004427343  ;;  %v209_v33 = vmul.f32 -0.5, %v642_v47  ;;  %433 = vlog2.f32 %v689_v46 }
  0x36   :  { %v418_v58 = vpop.eup %417  ;;  %v136_v37 = vmul.f32 0.6931472, %v416_v9  ;;  %vm712_vm7 = vcmp.lt.f32.partialorder %v185_v10, 0.0004427343  ;;  %v201_v61 = vadd.f32 1.0, %v200_v44  ;;  %v717_v41 = vmul.f32 %v599_v17, %v183_v11 }
  0x37   :  { %v420_v52 = vpop.eup %419  ;;  %v720_v18 = vmul.f32 %v612_v26, %v192_v45  ;;  %vm722_vm8 = vcmp.lt.f32.partialorder %v194_v62, 0.0004427343  ;;  %v212_v9 = vand.u32 2147483647, %v642_v47  ;;  %v124_v10 = vsel %vm636_vm0, %v629_v40, %v118_v60 }
  0x38   :  { %v422_v13 = vpop.eup %421  ;;  %v145_v8 = vmul.f32 0.6931472, %v418_v58  ;;  %vm730_vm9 = vcmp.lt.f32.partialorder %v203_v29, 0.0004427343  ;;  %435 = vrcp.f32 %v563_v53  ;;  %v133_v62 = vsel %vm644_vm1, %v655_v21, %v127_v57 }
  0x39   :  { %v424_v11 = vpop.eup %423  ;;  %v210_v45 = vadd.f32 1.0, %v209_v33  ;;  %v218_v26 = vmul.f32 -0.5, %v665_v31  ;;  %437 = vrcp.f32 %v568_v55  ;;  %v142_v58 = vsel %vm660_vm2, %v658_v24, %v136_v37 }
  0x3a   :  { %v426_v17 = vpop.eup %425  ;;  %v202_v60 = vmul.f32 %v624_v36, %v201_v61  ;;  %v221_v40 = vand.u32 2147483647, %v665_v31  ;;  %439 = vrcp.f32 %v571_v56  ;;  %v154_v43 = vmul.f32 0.6931472, %v420_v52 }
  0x3b   :  { %v428_v53 = vpop.eup %427  ;;  %v163_v50 = vmul.f32 0.6931472, %v422_v13  ;;  %vm746_vm10 = vcmp.lt.f32.partialorder %v212_v9, 0.0004427343  ;;  %441 = vrcp.f32 %v585_v5  ;;  %v151_v55 = vsel %vm673_vm3, %v671_v23, %v145_v8 }
  0x3c   :  { %v172_v21 = vmul.f32 0.6931472, %v424_v11  ;;  %v942_v61 = vmax.f32 %v520_v0, 0.0  ;;  %443 = vrcp.f32 %v597_v15  ;;  %v181_v52 = vmul.f32 0.6931472, %v426_v17 }
  0x3d   :  { %v430_v56 = vpop.eup %429  ;;  %v211_v28 = vmul.f32 %v642_v47, %v210_v45  ;;  %v219_v29 = vadd.f32 1.0, %v218_v26  ;;  %445 = vrcp.f32 %v605_v22  ;;  %v190_v5 = vmul.f32 0.6931472, %v428_v53 }
  0x3e   :  { %v756_v24 = vadd.f32 %v124_v10, %v942_v61  ;;  %vm762_vm12 = vcmp.lt.f32.partialorder %v221_v40, 0.0004427343  ;;  %v945_v8 = vmax.f32 %v522_v1, 0.0  ;;  %447 = vrcp.f32 %v610_v25 }
  0x3f   :  { %v160_v15 = vsel %vm691_vm4, %v678_v39, %v154_v43  ;;  %v169_v17 = vsel %vm698_vm5, %v696_v51, %v163_v50  ;;  %v199_v22 = vmul.f32 0.6931472, %v430_v56  ;;  %449 = vrcp.f32 %v622_v34 }
  0x40   :  { %v768_v23 = vadd.f32 %v133_v62, %v945_v8  ;;  %v432_v26 = vpop.eup %431  ;;  %v178_v25 = vsel %vm703_vm6, %v710_v32, %v172_v21  ;;  %v946_v33 = vmax.f32 %v524_v2, 0.0  ;;  %v789_v39 = vadd.f32 %v151_v55, %v947_v59 }
  0x41   :  { %451 = vrcp.f32 %v634_v42  ;;  %v187_v34 = vsel %vm712_vm7, %v717_v41, %v181_v52  ;;  %v208_v51 = vmul.f32 0.6931472, %v432_v26  ;;  %v220_v54 = vmul.f32 %v665_v31, %v219_v29 }
  0x42   :  { %v785_v37 = vadd.f32 %v142_v58, %v946_v33  ;;  %453 = vrcp.f32 %v652_v19  ;;  %vm264_vm0 = vcmp.ge.f32.partialorder %v528_v4, 0.0  ;;  %v434_v63 = vpop.eup %433  ;;  %v196_v32 = vsel %vm722_vm8, %v720_v18, %v190_v5 }
  0x43   :  { %v948_v42 = vmax.f32 %v528_v4, 0.0  ;;  %v949_v13 = vmax.f32 %v531_v6, 0.0  ;;  %455 = vrcp.f32 %v682_v14  ;;  %vm265_vm1 = vcmp.ge.f32.partialorder %v531_v6, 0.0 }
  0x44   :  { %v205_v19 = vsel %vm730_vm9, %v202_v60, %v199_v22  ;;  %v217_v41 = vmul.f32 0.6931472, %v434_v63  ;;  %v950_v10 = vmax.f32 %v533_v7, 0.0  ;;  %457 = vrcp.f32 %v689_v46 }
  0x45   :  { %v804_v9 = vadd.f32 %v160_v15, %v948_v42  ;;  %v808_v27 = vadd.f32 %v169_v17, %v949_v13  ;;  %vm266_vm2 = vcmp.ge.f32.partialorder %v533_v7, 0.0  ;;  %v214_v18 = vsel %vm746_vm10, %v211_v28, %v208_v51  ;;  %v436_v62 = vpop.eup %435  ;;  %v960_v42 = vld [vmem:[#allocation13_spill] sm:$0xff] }
  0x46   :  { %v816_v35 = vadd.f32 %v178_v25, %v950_v10  ;;  %v951_v11 = vmax.f32 %v539_v12, 0.0  ;;  %vm267_vm3 = vcmp.ge.f32.partialorder %v539_v12, 0.0  ;;  %v296_v44 = vmin.f32 %v756_v24, 100.0  ;;  %v438_v53 = vpop.eup %437  ;;  %v958_v25 = vld [vmem:[#allocation10_spill] sm:$0xff] }
  0x47   :  { %v223_v45 = vsel %vm762_vm12, %v220_v54, %v217_v41  ;;  %v952_v58 = vmax.f32 %v543_v16, 0.0  ;;  %vm268_vm4 = vcmp.ge.f32.partialorder %v543_v16, 0.0  ;;  %v297_v60 = vmin.f32 %v768_v23, 100.0  ;;  %v440_v61 = vpop.eup %439  ;;  %v957_v23 = vld [vmem:[#allocation9_spill] sm:$0xff]  ;;  %v961_v41 = vld [vmem:[#allocation12_spill] sm:$0xff]  ;;  %v962_v10 = vld [vmem:[#allocation14_spill] sm:$0xff] }
  0x48   :  { %v824_v14 = vadd.f32 %v187_v34, %v951_v11  ;;  %v298_v40 = vmin.f32 %v785_v37, 100.0  ;;  %v953_v43 = vmax.f32 %v545_v20, 0.0  ;;  %vm269_vm5 = vcmp.ge.f32.partialorder %v545_v20, 0.0  ;;  %v442_v5 = vpop.eup %441  ;;  %v959_v34 = vld [vmem:[#allocation11_spill] sm:$0xff] }
  0x49   :  { %v832_v46 = vadd.f32 %v196_v32, %v952_v58  ;;  %v272_v57 = vmul.f32 %v436_v62, %v556_v48  ;;  %v299_v55 = vmin.f32 %v789_v39, 100.0  ;;  %v300_v21 = vmin.f32 %v804_v9, 100.0  ;;  %v444_v26 = vpop.eup %443 }
  0x4a   :  { %v839_v50 = vadd.f32 %v205_v19, %v953_v43  ;;  %v954_v24 = vmax.f32 %v549_v30, 0.0  ;;  %vm270_vm6 = vcmp.ge.f32.partialorder %v549_v30, 0.0  ;;  %v273_v52 = vmul.f32 %v438_v53, %v558_v49  ;;  %v446_v39 = vpop.eup %445 }
  0x4b   :  { %v301_v28 = vmin.f32 %v808_v27, 100.0  ;;  %v302_v29 = vmin.f32 %v816_v35, 100.0  ;;  %v956_v8 = vmax.f32 %v955_v38, 0.0  ;;  %vm271_vm7 = vcmp.ge.f32.partialorder %v955_v38, 0.0  ;;  %v448_v32 = vpop.eup %447 }
  0x4c   :  { %v234_v56 = vadd.f32 %v214_v18, %v954_v24  ;;  %v274_v15 = vmul.f32 %v440_v61, %v957_v23  ;;  %v284_v17 = vsel %vm260_vm11, %v436_v62, %v272_v57  ;;  %v303_v22 = vmin.f32 %v824_v14, 100.0  ;;  %v450_v19 = vpop.eup %449 }
  0x4d   :  { %v235_v48 = vadd.f32 %v223_v45, %v956_v8  ;;  %v275_v49 = vmul.f32 %v442_v5, %v958_v25  ;;  %v285_v33 = vsel %vm261_vm13, %v438_v53, %v273_v52  ;;  %v304_v37 = vmin.f32 %v832_v46, 100.0 }
  0x4e   :  { %v308_v59 = vmul.f32 %v296_v44, %v284_v17  ;;  %v276_v51 = vmul.f32 %v444_v26, %v959_v34  ;;  %v286_v54 = vsel %vm262_vm14, %v440_v61, %v274_v15  ;;  %v305_v0 = vmin.f32 %v839_v50, 100.0  ;;  %v452_v14 = vpop.eup %451  ;;  %v963_v44 = vld [vmem:[#allocation15_spill] sm:$0xff] }
  0x4f   :  { %v309_v63 = vmul.f32 %v297_v60, %v285_v33  ;;  %v277_v9 = vmul.f32 %v446_v39, %v960_v42  ;;  %v287_v13 = vsel %vm263_vm15, %v442_v5, %v275_v49  ;;  %v306_v1 = vmin.f32 %v234_v56, 100.0  ;;  %v454_v46 = vpop.eup %453  ;;  %v964_v60 = vld [vmem:[#allocation16_spill] sm:$0xff] }
  0x50   :  { %v310_v27 = vmul.f32 %v298_v40, %v286_v54  ;;  %vm43_vm8 = vcmp.lt.s32.totalorder %v961_v41, 682  ;;  %v278_v35 = vmul.f32 %v448_v32, %v962_v10  ;;  %v288_v2 = vsel %vm264_vm0, %v444_v26, %v276_v51  ;;  %v456_v4 = vpop.eup %455 }
  0x51   :  { %v307_v18 = vmin.f32 %v235_v48, 100.0  ;;  %v311_v11 = vmul.f32 %v299_v55, %v287_v13  ;;  %v279_v62 = vmul.f32 %v450_v19, %v963_v44  ;;  %v289_v45 = vsel %vm265_vm1, %v446_v39, %v277_v9  ;;  %v458_v6 = vpop.eup %457 }
  0x52   :  { %v320_v3 = vmul.f32 %v308_v59, %v284_v17  ;;  %v321_v58 = vmul.f32 %v309_v63, %v285_v33  ;;  %v280_v40 = vmul.f32 %v452_v14, %v964_v60  ;;  %v290_v53 = vsel %vm266_vm2, %v448_v32, %v278_v35 }
  0x53   :  { %v312_v43 = vmul.f32 %v300_v21, %v288_v2  ;;  %v313_v50 = vmul.f32 %v301_v28, %v289_v45  ;;  %v281_v57 = vmul.f32 %v454_v46, %v624_v36  ;;  %v291_v55 = vsel %vm267_vm3, %v450_v19, %v279_v62 }
  0x54   :  { %v314_v61 = vmul.f32 %v302_v29, %v290_v53  ;;  %v322_v24 = vmul.f32 %v310_v27, %v286_v54  ;;  %v282_v56 = vmul.f32 %v456_v4, %v642_v47  ;;  %v292_v52 = vsel %vm268_vm4, %v452_v14, %v280_v40 }
  0x55   :  { %v315_v5 = vmul.f32 %v303_v22, %v291_v55  ;;  %v323_v8 = vmul.f32 %v311_v11, %v287_v13  ;;  %v283_v7 = vmul.f32 %v458_v6, %v665_v31  ;;  %v293_v21 = vsel %vm269_vm5, %v454_v46, %v281_v57 }
  0x56   :  { %v316_v28 = vmul.f32 %v304_v37, %v292_v52  ;;  %v326_v36 = vmul.f32 %v314_v61, %v290_v53  ;;  %v294_v12 = vsel %vm270_vm6, %v456_v4, %v282_v56  ;;  %v317_v29 = vmul.f32 %v305_v0, %v293_v21 }
  0x57   :  { %v325_v48 = vmul.f32 %v313_v50, %v289_v45  ;;  %v327_v23 = vmul.f32 %v315_v5, %v291_v55  ;;  %v295_v47 = vsel %vm271_vm7, %v458_v6, %v283_v7  ;;  %v318_v16 = vmul.f32 %v306_v1, %v294_v12 }
  0x58   :  { %v328_v15 = vmul.f32 %v316_v28, %v292_v52  ;;  %v356_v17 = vadd.f32 %v326_v36, %v320_v3  ;;  %v319_v22 = vmul.f32 %v307_v18, %v295_v47  ;;  %v324_v26 = vmul.f32 %v312_v43, %v288_v2 }
  0x59   :  { %v329_v31 = vmul.f32 %v317_v29, %v293_v21  ;;  %v357_v25 = vadd.f32 %v327_v23, %v321_v58  ;;  %v330_v20 = vmul.f32 %v318_v16, %v294_v12  ;;  %v349_v30 = vsel %vm43_vm8, %v325_v48, 0.0 }
  0x5a   :  { %v358_v49 = vadd.f32 %v328_v15, %v322_v24  ;;  %v331_v33 = vmul.f32 %v319_v22, %v295_v47 }
  0x5b   :  { %v359_v37 = vadd.f32 %v329_v31, %v323_v8  ;;  %v362_v59 = vadd.f32 %v357_v25, %v356_v17  ;;  %v360_v38 = vadd.f32 %v330_v20, %v324_v26 }
  0x5c   :  { %v355_v39 = vsel %vm43_vm8, %v331_v33, 0.0 }
  0x5d   :  { %v363_v34 = vadd.f32 %v362_v59, %v358_v49  ;;  %v361_v51 = vadd.f32 %v355_v39, %v349_v30 }
  0x5f   :  { %v364_v54 = vadd.f32 %v363_v34, %v359_v37 }
  0x61   :  { %v365_v0 = vadd.f32 %v364_v54, %v360_v38 }
  0x63   :  { %v366_v63 = vadd.f32 %v365_v0, %v361_v51 }
  0x65   :  { %367 = vst [vmem:[#allocation5] sm:$0xff] %v366_v63 }
  0x66   :  { %490 = shalt.err (!%p487_p9)
}
  0x67   :  { %377 = dma.vmem_to_hbm [thread:$0]  %s375_s13, 128, %s900_s1, [#allocation4]  }
  0x68   :  { %501 = dma.done.wait [#allocation4], 128  }
  0x69   :  { %502 = vsyncadd [#allocation4], 4294967168 }
  0x6a   :  { %381 = vsyncpa [#allocation3], 1 }
  0x6b   :  { %382 = vsyncpa [#allocation4], 1 }

</bundles_post_ra>
